<compile_context>
chip_gen: v5e
topology: v5e:2x2
jax: 0.10.0
libtpu: 0.0.40
codegen_flags: <defaults>
</compile_context>

<pallas_src>
import numpy as np
import jax
import jax.numpy as jnp
from jax.experimental import pallas as pl
from jax.experimental.pallas import tpu as pltpu


# ----------------------------- Pallas kernel --------------------------------
def _rnn_memory_kernel(delta_ref, mem_in_ref, mem_ref, h_ref,
                       tw_ref, w_in_ref, w_t_ref, w_hh_ref, b_pre_ref,
                       w_nf_ref, b_nf_ref,
                       upd_ref, hout_ref):
    # TimeEncode: cos(dt * w) over the logical dim_time lanes only.  The phase
    # bias of TimeEncode is the fixed all-zero, non-trainable buffer, so the
    # "+ b" is omitted (see pack_params).
    time_feat = jnp.cos(delta_ref[...] * tw_ref[...])              # (tile_n, dim_time) f32

    # nn.RNNCell pre-activation as accumulating small-K MXU dots (no scratch
    # round-trip): x @ W_ih^T + b_ih + mem @ W_hh^T + b_hh, with the two biases
    # folded into b_pre.  Accumulation is f32.
    pre = (jnp.dot(mem_in_ref[...], w_in_ref[...],
                   preferred_element_type=jnp.float32)
           + jnp.dot(time_feat.astype(w_t_ref.dtype), w_t_ref[...],
                     preferred_element_type=jnp.float32)
           + jnp.dot(mem_ref[...], w_hh_ref[...],
                     preferred_element_type=jnp.float32)
           + b_pre_ref[...])
    upd = jnp.tanh(pre)                                            # (tile_n, dim_hid) f32
    upd_ref[...] = upd.astype(upd_ref.dtype)

    # combine_node_feature (dim_node_feat > 0 and != dim_hid branch):
    #   h = updated_memory + node_feat_map(h)
    hout_ref[...] = (upd
                     + jnp.dot(h_ref[...], w_nf_ref[...],
                               preferred_element_type=jnp.float32)
                     + b_nf_ref[...]).astype(hout_ref.dtype)


# ------------------------------- wrapper -------------------------------------
def rnn_memory_updater_fwd(mem_input, ts, mem_ts, mem, h, params):
    """Returns (last_updated_memory, new_h) for one MFG block.

    The compute dtype for activations / matmul weights is whatever dtype
    `pack_params` baked into the weights (bf16 by default).  To amortize launch
    overhead the caller may concatenate the rows of several MFG blocks and call
    this once (the row-tiled grid handles arbitrary N).
    """
    n, dim_in = mem_input.shape
    dim_hid = mem.shape[1]
    dim_node_feat = h.shape[1]
    dim_time = params["time_w"].shape[1]

    act = jnp.dtype(params["w_in"].dtype)
    act_b = act.itemsize

    # Lane-narrow (unpadded) activations.  Casts are no-ops when the caller
    # already holds them in the compute dtype.
    delta = (ts - mem_ts).reshape(n, 1).astype(jnp.float32)
    mem_in = mem_input.astype(act)
    mem_c = mem.astype(act)
    h_c = h.astype(act)

    # Row tile: multiple of 128, start big (per-row VMEM cost is tiny), cap at
    # ~n/4 so the BlockSpec pipeline has >=4 steps (and the v7x megacore split
    # has work), shrink if the double-buffered tiles would exceed ~32 MiB
    # (safe inside v7x's 64 MiB per-TC VMEM), and never exceed n itself.
    tile_n = min(1024, max(128, (n // (4 * 128)) * 128))
    per_row = (2 * (4 + (dim_in + dim_hid + dim_node_feat) * act_b)   # dbl-buffered inputs
               + 2 * 2 * dim_hid * 4)                                 # two f32 outputs, dbl-buffered
    while tile_n > 128 and tile_n * per_row > 32 * 1024 * 1024:
        tile_n //= 2
    tile_n = min(tile_n, n)                     # small blocks: one exact tile
    grid = (pl.cdiv(n, tile_n),)                # edge block (if any) is masked

    def row_spec(cols):
        return pl.BlockSpec((tile_n, cols), lambda i: (i, 0))

    def const_spec(rows, cols):
        return pl.BlockSpec((rows, cols), lambda i: (0, 0))   # VMEM-resident across grid

    weight_bytes = ((dim_in + dim_time + dim_hid + dim_node_feat) * dim_hid * act_b
                    + (dim_time + 2 * dim_hid) * 4)
    vmem_est = tile_n * per_row + 2 * weight_bytes
    vmem_limit = int(min(max(4 * vmem_est, 16 * 1024 * 1024), 40 * 1024 * 1024))

    k_total = dim_in + dim_time + dim_hid + dim_node_feat
    cost = pl.CostEstimate(
        flops=2 * n * k_total * dim_hid,
        transcendentals=n * (dim_time + dim_hid),
        bytes_accessed=(n * (4 + (dim_in + dim_hid + dim_node_feat) * act_b)
                        + weight_bytes
                        + 2 * n * dim_hid * 4))

    upd, hout = pl.pallas_call(
        _rnn_memory_kernel,
        out_shape=(jax.ShapeDtypeStruct((n, dim_hid), jnp.float32),
                   jax.ShapeDtypeStruct((n, dim_hid), jnp.float32)),
        grid_spec=pltpu.PrefetchScalarGridSpec(
            num_scalar_prefetch=0,
            grid=grid,
            in_specs=[row_spec(1),                         # delta = ts - mem_ts
                      row_spec(dim_in),                    # mem_input
                      row_spec(dim_hid),                   # mem
                      row_spec(dim_node_feat),             # h (node features)
                      const_spec(1, dim_time),             # TimeEncode weights
                      const_spec(dim_in, dim_hid),         # W_ih (mem_input rows)^T
                      const_spec(dim_time, dim_hid),       # W_ih (time rows)^T
                      const_spec(dim_hid, dim_hid),        # W_hh^T
                      const_spec(1, dim_hid),              # folded b_ih + b_hh
                      const_spec(dim_node_feat, dim_hid),  # W_nf^T
                      const_spec(1, dim_hid)],             # b_nf
            out_specs=(row_spec(dim_hid), row_spec(dim_hid)),
        ),
        compiler_params=pltpu.CompilerParams(
            dimension_semantics=("parallel",),
            vmem_limit_bytes=vmem_limit),
        cost_estimate=cost,
    )(delta, mem_in, mem_c, h_c,
      params["time_w"], params["w_in"], params["w_t"], params["w_hh"],
      params["b_pre"], params["w_nf"], params["b_nf"])

    return upd, hout


# --------------------------- parameter init / packing ------------------------
def init_raw_params(key, dim_in, dim_hid, dim_time, dim_node_feat):
    """PyTorch-layout parameters (as the nn.Module would hold them)."""
    ks = jax.random.split(key, 6)
    bh = 1.0 / np.sqrt(dim_hid)
    bn = 1.0 / np.sqrt(dim_node_feat)
    return {
        # torch.nn.RNNCell(dim_in + dim_time, dim_hid): uniform(-1/sqrt(h), 1/sqrt(h))
        "w_ih": jax.random.uniform(ks[0], (dim_hid, dim_in + dim_time), jnp.float32, -bh, bh),
        "w_hh": jax.random.uniform(ks[1], (dim_hid, dim_hid), jnp.float32, -bh, bh),
        "b_ih": jax.random.uniform(ks[2], (dim_hid,), jnp.float32, -bh, bh),
        "b_hh": jax.random.uniform(ks[3], (dim_hid,), jnp.float32, -bh, bh),
        # torch.nn.Linear(dim_node_feat, dim_hid)
        "w_nf": jax.random.uniform(ks[4], (dim_hid, dim_node_feat), jnp.float32, -bn, bn),
        "b_nf": jax.random.uniform(ks[5], (dim_hid,), jnp.float32, -bn, bn),
        # TimeEncode(dim_time): fixed w = 1/10**linspace(0,9,dim_time), phase b = 0
        "time_w": jnp.asarray(1.0 / 10 ** np.linspace(0, 9, dim_time, dtype=np.float32)),
        "time_b": jnp.zeros((dim_time,), jnp.float32),
    }


def pack_params(raw, *, compute_dtype=jnp.bfloat16):
    """Kernel-layout parameters: transposed (K, dim_hid) weights split by input
    source (no lane padding), RNNCell biases folded, TimeEncode weights as a
    (1, dim_time) row.  Matmul weights are stored in `compute_dtype`; biases and
    time weights stay f32 (they feed f32 intermediates).

    NOTE: TimeEncode's phase bias is the fixed all-zero, non-trainable buffer in
    the reference module and is therefore dropped; a checkpoint with a nonzero
    phase would need it re-added in the kernel.
    """
    act = jnp.dtype(compute_dtype)
    w_ih = np.asarray(raw["w_ih"], np.float32)            # (dim_hid, dim_in + dim_time)
    dim_time = int(np.asarray(raw["time_w"]).shape[0])
    dim_in = w_ih.shape[1] - dim_time
    return {
        "time_w": jnp.asarray(np.asarray(raw["time_w"], np.float32)[None, :]),
        "w_in": jnp.asarray(w_ih[:, :dim_in].T, dtype=act),
        "w_t": jnp.asarray(w_ih[:, dim_in:].T, dtype=act),
        "w_hh": jnp.asarray(np.asarray(raw["w_hh"], np.float32).T, dtype=act),
        "b_pre": jnp.asarray((np.asarray(raw["b_ih"], np.float32)
                              + np.asarray(raw["b_hh"], np.float32))[None, :]),
        "w_nf": jnp.asarray(np.asarray(raw["w_nf"], np.float32).T, dtype=act),
        "b_nf": jnp.asarray(np.asarray(raw["b_nf"], np.float32)[None, :]),
    }


# --------------------------- pure-JAX reference -------------------------------
def _reference(mem_input, ts, mem_ts, mem, h, raw):
    delta = (ts - mem_ts).reshape(-1, 1)
    time_feat = jnp.cos(delta * raw["time_w"][None, :] + raw["time_b"][None, :])
    x = jnp.concatenate([mem_input, time_feat], axis=1)
    pre = x @ raw["w_ih"].T + raw["b_ih"] + mem @ raw["w_hh"].T + raw["b_hh"]
    upd = jnp.tanh(pre)
    hout = upd + h @ raw["w_nf"].T + raw["b_nf"]
    return upd, hout


if __name__ == "__main__":
    # Small shapes consistent with the module's forward.
    N = 16               # number of src nodes in the MFG block
    dim_in = 32          # mem_input feature dim
    dim_hid = 32         # memory / hidden dim
    dim_time = 16        # time encoding dim (> 0)
    dim_node_feat = 24   # node feature dim (> 0 and != dim_hid -> Linear branch)

    key = jax.random.PRNGKey(0)
    kp, k1, k2, k3, k4, k5 = jax.random.split(key, 6)

    raw = init_raw_params(kp, dim_in, dim_hid, dim_time, dim_node_feat)

    mem_input = jax.random.normal(k1, (N, dim_in), jnp.float32)
    mem = jax.random.normal(k2, (N, dim_hid), jnp.float32)
    h = jax.random.normal(k3, (N, dim_node_feat), jnp.float32)
    ts = jax.random.uniform(k4, (N,), jnp.float32, 0.0, 100.0)
    mem_ts = ts - jax.random.uniform(k5, (N,), jnp.float32, 0.0, 10.0)

    ref_upd, ref_hout = _reference(mem_input, ts, mem_ts, mem, h, raw)

    # f32 path (faithful to the PyTorch f32 module).
    params_f32 = pack_params(raw, compute_dtype=jnp.float32)
    upd, hout = rnn_memory_updater_fwd(mem_input, ts, mem_ts, mem, h, params_f32)
    jax.block_until_ready((upd, hout))
    np.testing.assert_allclose(np.asarray(upd), np.asarray(ref_upd), rtol=1e-4, atol=1e-4)
    np.testing.assert_allclose(np.asarray(hout), np.asarray(ref_hout), rtol=1e-4, atol=1e-4)

    # bf16 path (default; halves input HBM traffic on a bandwidth-bound kernel;
    # cos/tanh and MXU accumulation stay f32).
    params_bf16 = pack_params(raw)   # compute_dtype defaults to bf16
    upd_bf, hout_bf = rnn_memory_updater_fwd(mem_input, ts, mem_ts, mem, h, params_bf16)
    jax.block_until_ready((upd_bf, hout_bf))
    np.testing.assert_allclose(np.asarray(upd_bf), np.asarray(ref_upd), rtol=6e-2, atol=6e-2)
    np.testing.assert_allclose(np.asarray(hout_bf), np.asarray(ref_hout), rtol=6e-2, atol=6e-2)

    # TODO(synk): last_updated_ts / last_updated_nid are pure bookkeeping
    # (detach/clone of inputs) handled by the caller outside the kernel; the
    # other combine_node_feature branches (dim_node_feat == dim_hid or == 0)
    # are trivial caller-side adds and are not implemented here.
    print("KERNEL_OK")
</pallas_src>

<mosaic_0001>
module attributes {stable_mosaic.version = 11 : i64} {
  func.func @_rnn_memory_kernel(%arg0: i32, %arg1: memref<16x1xf32, #tpu.memory_space<vmem>>, %arg2: memref<16x32xf32, #tpu.memory_space<vmem>>, %arg3: memref<16x32xf32, #tpu.memory_space<vmem>>, %arg4: memref<16x24xf32, #tpu.memory_space<vmem>>, %arg5: memref<1x16xf32, #tpu.memory_space<vmem>>, %arg6: memref<32x32xf32, #tpu.memory_space<vmem>>, %arg7: memref<16x32xf32, #tpu.memory_space<vmem>>, %arg8: memref<32x32xf32, #tpu.memory_space<vmem>>, %arg9: memref<1x32xf32, #tpu.memory_space<vmem>>, %arg10: memref<24x32xf32, #tpu.memory_space<vmem>>, %arg11: memref<1x32xf32, #tpu.memory_space<vmem>>, %arg12: memref<16x32xf32, #tpu.memory_space<vmem>>, %arg13: memref<16x32xf32, #tpu.memory_space<vmem>>) attributes {dimension_semantics = [#tpu.dimension_semantics<parallel>], iteration_bounds = array<i64: 1>, scalar_prefetch = 0 : i64, scratch_operands = 0 : i64, tpu.core_type = #tpu.core_type<tc>, window_params = [{transform_indices = @transform_0, window_bounds = array<i64: 16, 1>}, {transform_indices = @transform_1, window_bounds = array<i64: 16, 32>}, {transform_indices = @transform_2, window_bounds = array<i64: 16, 32>}, {transform_indices = @transform_3, window_bounds = array<i64: 16, 24>}, {pipeline_mode = #tpu.pipeline_mode<synchronous>, transform_indices = @transform_4, window_bounds = array<i64: 1, 16>}, {pipeline_mode = #tpu.pipeline_mode<synchronous>, transform_indices = @transform_5, window_bounds = array<i64: 32, 32>}, {pipeline_mode = #tpu.pipeline_mode<synchronous>, transform_indices = @transform_6, window_bounds = array<i64: 16, 32>}, {pipeline_mode = #tpu.pipeline_mode<synchronous>, transform_indices = @transform_7, window_bounds = array<i64: 32, 32>}, {pipeline_mode = #tpu.pipeline_mode<synchronous>, transform_indices = @transform_8, window_bounds = array<i64: 1, 32>}, {pipeline_mode = #tpu.pipeline_mode<synchronous>, transform_indices = @transform_9, window_bounds = array<i64: 24, 32>}, {pipeline_mode = #tpu.pipeline_mode<synchronous>, transform_indices = @transform_10, window_bounds = array<i64: 1, 32>}, {transform_indices = @transform_11, window_bounds = array<i64: 16, 32>}, {transform_indices = @transform_12, window_bounds = array<i64: 16, 32>}]} {
    %c0 = arith.constant 0 : index
    %c0_0 = arith.constant 0 : index
    %0 = vector.load %arg1[%c0, %c0_0] : memref<16x1xf32, #tpu.memory_space<vmem>>, vector<16x1xf32>
    %c0_1 = arith.constant 0 : index
    %c0_2 = arith.constant 0 : index
    %1 = vector.load %arg5[%c0_1, %c0_2] : memref<1x16xf32, #tpu.memory_space<vmem>>, vector<1x16xf32>
    %2 = vector.broadcast %0 : vector<16x1xf32> to vector<16x16xf32>
    %3 = vector.broadcast %1 : vector<1x16xf32> to vector<16x16xf32>
    %4 = arith.mulf %2, %3 : vector<16x16xf32>
    %5 = math.cos %4 : vector<16x16xf32>
    %c0_3 = arith.constant 0 : index
    %c0_4 = arith.constant 0 : index
    %6 = vector.load %arg2[%c0_3, %c0_4] : memref<16x32xf32, #tpu.memory_space<vmem>>, vector<16x32xf32>
    %c0_5 = arith.constant 0 : index
    %c0_6 = arith.constant 0 : index
    %7 = vector.load %arg6[%c0_5, %c0_6] : memref<32x32xf32, #tpu.memory_space<vmem>>, vector<32x32xf32>
    %cst = arith.constant dense<0.000000e+00> : vector<16x32xf32>
    %8 = tpu.matmul %6, %7, %cst {dimension_numbers = #tpu.dot_dimension_numbers<[1], [0], [0], [1], [0, 0, 1, 1], [], []>} : vector<16x32xf32>, vector<32x32xf32>, vector<16x32xf32> -> vector<16x32xf32>
    %c0_7 = arith.constant 0 : index
    %c0_8 = arith.constant 0 : index
    %9 = vector.load %arg7[%c0_7, %c0_8] : memref<16x32xf32, #tpu.memory_space<vmem>>, vector<16x32xf32>
    %cst_9 = arith.constant dense<0.000000e+00> : vector<16x32xf32>
    %10 = tpu.matmul %5, %9, %cst_9 {dimension_numbers = #tpu.dot_dimension_numbers<[1], [0], [0], [1], [0, 0, 1, 1], [], []>} : vector<16x16xf32>, vector<16x32xf32>, vector<16x32xf32> -> vector<16x32xf32>
    %11 = arith.addf %8, %10 : vector<16x32xf32>
    %c0_10 = arith.constant 0 : index
    %c0_11 = arith.constant 0 : index
    %12 = vector.load %arg3[%c0_10, %c0_11] : memref<16x32xf32, #tpu.memory_space<vmem>>, vector<16x32xf32>
    %c0_12 = arith.constant 0 : index
    %c0_13 = arith.constant 0 : index
    %13 = vector.load %arg8[%c0_12, %c0_13] : memref<32x32xf32, #tpu.memory_space<vmem>>, vector<32x32xf32>
    %cst_14 = arith.constant dense<0.000000e+00> : vector<16x32xf32>
    %14 = tpu.matmul %12, %13, %cst_14 {dimension_numbers = #tpu.dot_dimension_numbers<[1], [0], [0], [1], [0, 0, 1, 1], [], []>} : vector<16x32xf32>, vector<32x32xf32>, vector<16x32xf32> -> vector<16x32xf32>
    %15 = arith.addf %11, %14 : vector<16x32xf32>
    %c0_15 = arith.constant 0 : index
    %c0_16 = arith.constant 0 : index
    %16 = vector.load %arg9[%c0_15, %c0_16] : memref<1x32xf32, #tpu.memory_space<vmem>>, vector<1x32xf32>
    %17 = vector.broadcast %16 : vector<1x32xf32> to vector<16x32xf32>
    %18 = arith.addf %15, %17 : vector<16x32xf32>
    %19 = math.tanh %18 : vector<16x32xf32>
    %c0_17 = arith.constant 0 : index
    %c0_18 = arith.constant 0 : index
    %20 = vector.load %arg12[%c0_17, %c0_18] : memref<16x32xf32, #tpu.memory_space<vmem>>, vector<16x32xf32>
    tpu.vector_store %arg12[%c0_17, %c0_18], %19 {strides = array<i32>} : memref<16x32xf32, #tpu.memory_space<vmem>>, vector<16x32xf32>,
    %c0_19 = arith.constant 0 : index
    %c0_20 = arith.constant 0 : index
    %21 = vector.load %arg4[%c0_19, %c0_20] : memref<16x24xf32, #tpu.memory_space<vmem>>, vector<16x24xf32>
    %c0_21 = arith.constant 0 : index
    %c0_22 = arith.constant 0 : index
    %22 = vector.load %arg10[%c0_21, %c0_22] : memref<24x32xf32, #tpu.memory_space<vmem>>, vector<24x32xf32>
    %cst_23 = arith.constant dense<0.000000e+00> : vector<16x32xf32>
    %23 = tpu.matmul %21, %22, %cst_23 {dimension_numbers = #tpu.dot_dimension_numbers<[1], [0], [0], [1], [0, 0, 1, 1], [], []>} : vector<16x24xf32>, vector<24x32xf32>, vector<16x32xf32> -> vector<16x32xf32>
    %24 = arith.addf %19, %23 : vector<16x32xf32>
    %c0_24 = arith.constant 0 : index
    %c0_25 = arith.constant 0 : index
    %25 = vector.load %arg11[%c0_24, %c0_25] : memref<1x32xf32, #tpu.memory_space<vmem>>, vector<1x32xf32>
    %26 = vector.broadcast %25 : vector<1x32xf32> to vector<16x32xf32>
    %27 = arith.addf %24, %26 : vector<16x32xf32>
    %c0_26 = arith.constant 0 : index
    %c0_27 = arith.constant 0 : index
    %28 = vector.load %arg13[%c0_26, %c0_27] : memref<16x32xf32, #tpu.memory_space<vmem>>, vector<16x32xf32>
    tpu.vector_store %arg13[%c0_26, %c0_27], %27 {strides = array<i32>} : memref<16x32xf32, #tpu.memory_space<vmem>>, vector<16x32xf32>,
    return
  }
  func.func @transform_0(%arg0: i32) -> (i32, i32) {
    %c0_i32 = arith.constant 0 : i32
    %c0_i32_0 = arith.constant 0 : i32
    return %arg0, %c0_i32 : i32, i32
  }
  func.func @transform_1(%arg0: i32) -> (i32, i32) {
    %c0_i32 = arith.constant 0 : i32
    %c0_i32_0 = arith.constant 0 : i32
    return %arg0, %c0_i32 : i32, i32
  }
  func.func @transform_2(%arg0: i32) -> (i32, i32) {
    %c0_i32 = arith.constant 0 : i32
    %c0_i32_0 = arith.constant 0 : i32
    return %arg0, %c0_i32 : i32, i32
  }
  func.func @transform_3(%arg0: i32) -> (i32, i32) {
    %c0_i32 = arith.constant 0 : i32
    %c0_i32_0 = arith.constant 0 : i32
    return %arg0, %c0_i32 : i32, i32
  }
  func.func @transform_4(%arg0: i32) -> (i32, i32) {
    %c0_i32 = arith.constant 0 : i32
    %c0_i32_0 = arith.constant 0 : i32
    %c0_i32_1 = arith.constant 0 : i32
    return %c0_i32, %c0_i32_0 : i32, i32
  }
  func.func @transform_5(%arg0: i32) -> (i32, i32) {
    %c0_i32 = arith.constant 0 : i32
    %c0_i32_0 = arith.constant 0 : i32
    %c0_i32_1 = arith.constant 0 : i32
    return %c0_i32, %c0_i32_0 : i32, i32
  }
  func.func @transform_6(%arg0: i32) -> (i32, i32) {
    %c0_i32 = arith.constant 0 : i32
    %c0_i32_0 = arith.constant 0 : i32
    %c0_i32_1 = arith.constant 0 : i32
    return %c0_i32, %c0_i32_0 : i32, i32
  }
  func.func @transform_7(%arg0: i32) -> (i32, i32) {
    %c0_i32 = arith.constant 0 : i32
    %c0_i32_0 = arith.constant 0 : i32
    %c0_i32_1 = arith.constant 0 : i32
    return %c0_i32, %c0_i32_0 : i32, i32
  }
  func.func @transform_8(%arg0: i32) -> (i32, i32) {
    %c0_i32 = arith.constant 0 : i32
    %c0_i32_0 = arith.constant 0 : i32
    %c0_i32_1 = arith.constant 0 : i32
    return %c0_i32, %c0_i32_0 : i32, i32
  }
  func.func @transform_9(%arg0: i32) -> (i32, i32) {
    %c0_i32 = arith.constant 0 : i32
    %c0_i32_0 = arith.constant 0 : i32
    %c0_i32_1 = arith.constant 0 : i32
    return %c0_i32, %c0_i32_0 : i32, i32
  }
  func.func @transform_10(%arg0: i32) -> (i32, i32) {
    %c0_i32 = arith.constant 0 : i32
    %c0_i32_0 = arith.constant 0 : i32
    %c0_i32_1 = arith.constant 0 : i32
    return %c0_i32, %c0_i32_0 : i32, i32
  }
  func.func @transform_11(%arg0: i32) -> (i32, i32) {
    %c0_i32 = arith.constant 0 : i32
    %c0_i32_0 = arith.constant 0 : i32
    return %arg0, %c0_i32 : i32, i32
  }
  func.func @transform_12(%arg0: i32) -> (i32, i32) {
    %c0_i32 = arith.constant 0 : i32
    %c0_i32_0 = arith.constant 0 : i32
    return %arg0, %c0_i32 : i32, i32
  }
}

</mosaic_0001>

<bundles_post_ra>
// kernel: tpu_custom_call.1
= control target key start
LH: loop header
LB: loop body
LE: loop exit
PB: predicated region body
PF: predicated region fallthrough
CT: control target
= control target key end

     0   :  { %18 = vsyncpa [#allocation3], 0  ;;  %s1288_s0 = inlined_call_operand.vmem [shape: f32[16,1], index: 0, kind: input, shape index: {}]   ;;  %s1289_s1 = inlined_call_operand.hbm [shape: f32[16,32], index: 1, kind: input, shape index: {}]   ;;  %s1290_s2 = inlined_call_operand.hbm [shape: f32[16,32], index: 2, kind: input, shape index: {}]   ;;  %s1291_s3 = inlined_call_operand.hbm [shape: f32[16,24], index: 3, kind: input, shape index: {}]   ;;  %s1292_s4 = inlined_call_operand.vmem [shape: f32[1,16], index: 4, kind: input, shape index: {}]   ;;  %s1293_s5 = inlined_call_operand.hbm [shape: f32[32,32], index: 5, kind: input, shape index: {}]   ;;  %s1294_s6 = inlined_call_operand.hbm [shape: f32[16,32], index: 6, kind: input, shape index: {}]   ;;  %s1295_s7 = inlined_call_operand.hbm [shape: f32[32,32], index: 7, kind: input, shape index: {}]   ;;  %s1296_s8 = inlined_call_operand.hbm [shape: f32[1,32], index: 8, kind: input, shape index: {}]   ;;  %s1297_s9 = inlined_call_operand.vmem [shape: f32[24,32], index: 9, kind: input, shape index: {}]   ;;  %s1298_s10 = inlined_call_operand.vmem [shape: f32[1,32], index: 10, kind: input, shape index: {}]   ;;  %s1299_s11 = inlined_call_operand.hbm [shape: f32[16,32], index: 11, kind: output, shape index: {0}]   ;;  %s1300_s12 = inlined_call_operand.hbm [shape: f32[16,32], index: 12, kind: output, shape index: {1}]  }
   0x1   :  { %19 = vsyncpa [#allocation6], 0 }
   0x2   :  { %20 = vsyncpa [#allocation9], 0 }
   0x3   :  { %21 = vsyncpa [#allocation12], 0 }
   0x4   :  { %22 = vsyncpa [#allocation4], 0 }
   0x5   :  { %23 = vsyncpa [#allocation16], 0  ;;  %s43_s23 = sshll.u32 %s1290_s2, 4  ;;  %s943_s24 = smov [#allocation5]   ;;  %s44_s23 = int_to_ptr.hbm [resolvable:$true] %s43_s23 }
   0x6   :  { %s45_s25 = sshll.u32 %s943_s24, 4  ;;  %s71_s28 = sshll.u32 %s1293_s5, 4  ;;  %s46_s25 = int_to_ptr.vmem [resolvable:$true] %s45_s25  ;;  %s72_s28 = int_to_ptr.hbm [resolvable:$true] %s71_s28 }
   0x7   :  { %s944_s29 = smov 128   ;;  %s945_s30 = smov 8  }
   0x8   :  { %51 = dma.hbm_to_vmem [thread:$0]  %s44_s23, 256, %s46_s25, [#allocation6], %s944_s29, %s944_s29, %s945_s30  }
   0x9   :  { %s946_s13 = smov [#allocation8]   ;;  %s97_s2 = sshll.u32 %s1295_s7, 4  ;;  %s98_s2 = int_to_ptr.hbm [resolvable:$true] %s97_s2 }
   0xa   :  { %s73_s14 = sshll.u32 %s946_s13, 4  ;;  %s30_s18 = sshll.u32 %s1289_s1, 4  ;;  %s74_s14 = int_to_ptr.vmem [resolvable:$true] %s73_s14  ;;  %s31_s18 = int_to_ptr.hbm [resolvable:$true] %s30_s18 }
   0xb   :  { %79 = dma.hbm_to_vmem [thread:$0]  %s72_s28, 512, %s74_s14, [#allocation9], %s944_s29, %s944_s29, %s945_s30  }
   0xc   :  { %s947_s19 = smov [#allocation11]   ;;  %s948_s21 = smov [#allocation2]  }
   0xd   :  { %s99_s20 = sshll.u32 %s947_s19, 4  ;;  %s32_s7 = sshll.u32 %s948_s21, 4  ;;  %s100_s20 = int_to_ptr.vmem [resolvable:$true] %s99_s20  ;;  %s33_s7 = int_to_ptr.vmem [resolvable:$true] %s32_s7 }
   0xe   :  { %105 = dma.hbm_to_vmem [thread:$0]  %s98_s2, 512, %s100_s20, [#allocation12], %s944_s29, %s944_s29, %s945_s30  }
   0xf   :  { %s56_s24 = sshll.u32 %s1291_s3, 4  ;;  %s84_s26 = sshll.u32 %s1294_s6, 4  ;;  %s57_s24 = int_to_ptr.hbm [resolvable:$true] %s56_s24  ;;  %s85_s26 = int_to_ptr.hbm [resolvable:$true] %s84_s26 }
  0x10   :  { %38 = dma.hbm_to_vmem [thread:$0]  %s31_s18, 256, %s33_s7, [#allocation3], %s944_s29, %s944_s29, %s945_s30  }
  0x11   :  { %s949_s27 = smov [#allocation7]   ;;  %s950_s13 = smov [#allocation10]  }
  0x12   :  { %s58_s28 = sshll.u32 %s949_s27, 4  ;;  %s86_s3 = sshll.u32 %s950_s13, 4  ;;  %s59_s28 = int_to_ptr.vmem [resolvable:$true] %s58_s28  ;;  %s87_s3 = int_to_ptr.vmem [resolvable:$true] %s86_s3 }
  0x13   :  { %64 = dma.hbm_to_vmem [thread:$0]  %s57_s24, 256, %s59_s28, [#allocation6], %s944_s29, %s944_s29, %s945_s30  }
  0x14   :  { %s111_s16 = sshll.u32 %s1296_s8, 4  ;;  %s951_s6 = smov [#allocation13]   ;;  %s112_s16 = int_to_ptr.hbm [resolvable:$true] %s111_s16 }
  0x15   :  { %92 = dma.hbm_to_vmem [thread:$0]  %s85_s26, 256, %s87_s3, [#allocation9], %s944_s29, %s944_s29, %s945_s30  }
  0x16   :  { %s113_s2 = sshll.u32 %s951_s6, 4  ;;  %s114_s2 = int_to_ptr.vmem [resolvable:$true] %s113_s2 }
  0x17   :  { %116 = dma.hbm_to_vmem [thread:$0]  %s112_s16, 16, %s114_s2, [#allocation12]  }
  0x18   :  { %931 = dma.done.wait [#allocation3], 256  }
  0x19   :  { %932 = vsyncadd [#allocation3], 4294967040 }
  0x1a   :  { %933 = dma.done.wait [#allocation6], 512  }
  0x1b   :  { %934 = vsyncadd [#allocation6], 4294966784 }
  0x1c   :  { %935 = dma.done.wait [#allocation9], 768  }
  0x1d   :  { %936 = vsyncadd [#allocation9], 4294966528 }
  0x1e   :  { %937 = dma.done.wait [#allocation12], 528  }
  0x1f   :  { %938 = vsyncadd [#allocation12], 4294966768  ;;  %v952_v0 = vmov 0   ;;  %v149_v1 = vld [vmem:[%s1288_s0] sm:$0xff]  ;;  %v150_v2 = vld [vmem:[%s1288_s0 + $0x8] sm:$0xff]  ;;  %vm513_vm0 = vcmask 261120  }
  0x20   :  { %707 = vset.pattern.permute.xlu0 %v952_v0  ;;  %v708_v3 = vld [vmem:[%s1292_s4] ss:$0 sm:$0xff]  ;;  %v548_v4 = vld [vmem:[#allocation11 + $0x18] sm:$0xff]  ;;  %v547_v5 = vld [vmem:[#allocation11 + $0x10] sm:$0xff]  ;;  %v953_v35 = vmov 2102212464  }
  0x21   :  { %154 = vperm.xlu0 %707, %v149_v1   ;;  %v480_v6 = vld [vmem:[#allocation8 + $0x18] sm:$0xff]  ;;  %567 = vmatpush.msra.mxu2 %v548_v4  ;;  %v479_v7 = vld [vmem:[#allocation8 + $0x10] sm:$0xff]  ;;  %v482_v10 = vld [vmem:[#allocation10 + $0x8] sm:$0xff]  ;;  %v954_v37 = vmov 920167782   ;;  %s959_s1 = smov [#allocation14]  }
  0x22   :  { %532 = vmatpush.msra.mxu1 %v480_v6  ;;  %v546_v9 = vld [vmem:[#allocation11 + $0x8] sm:$0xff]  ;;  %v478_v11 = vld [vmem:[#allocation8 + $0x8] sm:$0xff]  ;;  %v481_v13 = vld [vmem:[#allocation10] sm:$0xff]  ;;  %504 = vmatpush.msra.mxu0 %v482_v10  ;;  %v955_v40 = vmov 683565275   ;;  %s639_s25 = sshll.u32 %s959_s1, 4  ;;  %s640_s25 = int_to_ptr.vmem [resolvable:$true] %s639_s25 }
  0x23   :  { %568 = vmatpush.msra.mxu2 %v547_v5  ;;  %v545_v14 = vld [vmem:[#allocation11] sm:$0xff]  ;;  %v477_v15 = vld [vmem:[#allocation8] sm:$0xff]  ;;  %v956_v43 = vmov 1326507024   ;;  %v957_v45 = vmov 2475754826  }
  0x24   :  { %533 = vmatpush.msra.mxu1 %v479_v7  ;;  %v543_v17 = vld [vmem:[#allocation5] sm:$0xff]  ;;  %505 = vmatpush.msra.mxu0 %v481_v13  ;;  %v958_v49 = vmov 2131351028   ;;  %s960_s28 = smov [#allocation15]   ;;  %s654_s15 = sshll.u32 %s1300_s12, 4  ;;  %s655_s15 = int_to_ptr.hbm [resolvable:$true] %s654_s15 }
  0x25   :  { %569 = vmatpush.msra.mxu2 %v546_v9  ;;  %s652_s13 = sshll.u32 %s960_s28, 4  ;;  %s653_s13 = int_to_ptr.vmem [resolvable:$true] %s652_s13 }
  0x26   :  { %534 = vmatpush.msra.mxu1 %v478_v11 }
  0x27   :  { %570 = vmatpush.msra.mxu2 %v545_v14 }
  0x28   :  { %535 = vmatpush.msra.mxu1 %v477_v15  ;;  %685 = vmatmul.msk.f32.vlgmr.msra.gmra.mxu2 %vm513_vm0, %v543_v17 }
  0x29   :  { %159 = vperm.xlu0 %707, %v150_v2  }
  0x93   :  { %v155_v8 = vpop.permute.xlu0 %154 }
  0x94   :  { %v1075_v12 = vmul.f32 %v708_v3, %v155_v8 }
  0x96   :  { %v170_v16 = vand.u32 2139095040, %v1075_v12  ;;  %v167_v18 = vand.u32 2147483647, %v1075_v12 }
  0x98   :  { %v171_v19 = vshrl.u32 %v170_v16, 23  ;;  %v174_v20 = vand.u32 8388607, %v167_v18 }
  0x9a   :  { %v675_v21 = vadd.s32 4294967169, %v171_v19  ;;  %v175_v22 = vor.u32 8388608, %v174_v20 }
  0x9b   :  { %v160_v23 = vpop.permute.xlu0 %159 }
  0x9c   :  { %v177_v24 = vadd.s32 1, %v675_v21  ;;  %v1082_v25 = vmul.f32 %v708_v3, %v160_v23  ;;  %v1085_v27 = vshll.u32 %v175_v22, 8 }
  0x9e   :  { %vm178_vm1 = vcmp.gt.s32.totalorder %v177_v24, 0  ;;  %v324_v26 = vand.u32 2139095040, %v1082_v25  ;;  %v1090_v33 = vand.u32 65535, %v1085_v27  ;;  %v321_v34 = vand.u32 2147483647, %v1082_v25 }
  0x9f   :  { %v179_v28 = vsel %vm178_vm1, %v177_v24, 0  ;;  %v217_v19 = vshrl.u32 %v1085_v27, 16 }
  0xa0   :  { %v181_v29 = vand.u32 31, %v179_v28  ;;  %v325_v30 = vshrl.u32 %v324_v26, 23  ;;  %v1087_v31 = vshrl.u32 %v179_v28, 5  ;;  %v1108_v5 = vand.u32 8388607, %v321_v34 }
  0xa2   :  { %v182_v32 = vsub.s32 32, %v181_v29  ;;  %v193_v36 = vshll.u32 %v953_v35, %v181_v29  ;;  %v196_v38 = vshll.u32 %v954_v37, %v181_v29  ;;  %v678_v39 = vadd.s32 4294967169, %v325_v30 }
  0xa3   :  { %v184_v41 = vshll.u32 %v955_v40, %v181_v29  ;;  %v187_v47 = vshll.u32 %v957_v45, %v181_v29  ;;  %v190_v51 = vshll.u32 %v958_v49, %v181_v29  ;;  %vm202_vm2 = vcmp.lt.s32.totalorder %v1087_v31, 4 }
  0xa4   :  { %v194_v42 = vshrl.u32 %v954_v37, %v182_v32  ;;  %v197_v44 = vshrl.u32 %v956_v43, %v182_v32  ;;  %v185_v46 = vshrl.u32 %v957_v45, %v182_v32  ;;  %v331_v48 = vadd.s32 1, %v678_v39 }
  0xa5   :  { %v188_v50 = vshrl.u32 %v958_v49, %v182_v32  ;;  %v191_v52 = vshrl.u32 %v953_v35, %v182_v32  ;;  %v183_v56 = vshrl.u32 %v955_v40, %v182_v32  ;;  %vm199_vm4 = vcmp.lt.s32.totalorder %v1087_v31, 1 }
  0xa6   :  { %v195_v53 = vor.u32 %v194_v42, %v193_v36  ;;  %v198_v54 = vor.u32 %v197_v44, %v196_v38  ;;  %v186_v55 = vor.u32 %v185_v46, %v184_v41  ;;  %vm332_vm3 = vcmp.gt.s32.totalorder %v331_v48, 0 }
  0xa7   :  { %v189_v57 = vor.u32 %v188_v50, %v187_v47  ;;  %v192_v58 = vor.u32 %v191_v52, %v190_v51  ;;  %v333_v61 = vsel %vm332_vm3, %v331_v48, 0  ;;  %vm201_vm5 = vcmp.lt.s32.totalorder %v1087_v31, 3 }
  0xa8   :  { %v208_v59 = vsel %vm202_vm2, %v195_v53, 920167782  ;;  %v212_v60 = vsel %vm202_vm2, %v198_v54, 1326507024  ;;  %v1103_v62 = vand.u32 31, %v333_v61  ;;  %v1110_v6 = vshrl.u32 %v333_v61, 5 }
  0xa9   :  { %v204_v63 = vsel %vm202_vm2, %v192_v58, 2102212464  ;;  %v207_v1 = vsel %vm199_vm4, %v186_v55, %v189_v57  ;;  %v209_v2 = vsel %vm201_vm5, %v192_v58, %v208_v59  ;;  %v211_v3 = vsel %vm199_vm4, %v189_v57, %v192_v58 }
  0xaa   :  { %v213_v4 = vsel %vm201_vm5, %v195_v53, %v212_v60  ;;  %v1113_v7 = vsub.s32 32, %v1103_v62  ;;  %vm200_vm6 = vcmp.lt.s32.totalorder %v1087_v31, 2  ;;  %v203_v8 = vsel %vm199_vm4, %v183_v56, %v186_v55 }
  0xab   :  { %v350_v9 = vshll.u32 %v954_v37, %v1103_v62  ;;  %v205_v10 = vsel %vm201_vm5, %v189_v57, %v204_v63  ;;  %v210_v11 = vsel %vm200_vm6, %v207_v1, %v209_v2  ;;  %v214_v13 = vsel %vm200_vm6, %v211_v3, %v213_v4 }
  0xac   :  { %v348_v14 = vshrl.u32 %v954_v37, %v1113_v7  ;;  %v351_v15 = vshrl.u32 %v956_v43, %v1113_v7  ;;  %v218_v16 = vand.u32 65535, %v214_v13  ;;  %v219_v17 = vshrl.u32 %v214_v13, 16 }
  0xad   :  { %v240_v20 = vand.u32 65535, %v210_v11  ;;  %v241_v21 = vshrl.u32 %v210_v11, 16  ;;  %v347_v22 = vshll.u32 %v953_v35, %v1103_v62  ;;  %vm356_vm7 = vcmp.lt.s32.totalorder %v1110_v6, 4 }
  0xae   :  { %v352_v23 = vor.u32 %v351_v15, %v350_v9  ;;  %v221_v24 = vmul.u32 %v219_v17, %v1090_v33  ;;  %v1130_v26 = vsel %vm200_vm6, %v203_v8, %v205_v10  ;;  %v222_v28 = vmul.u32 %v218_v16, %v217_v19 }
  0xaf   :  { %v243_v29 = vmul.u32 %v241_v21, %v1090_v33  ;;  %v329_v30 = vor.u32 8388608, %v1108_v5  ;;  %v349_v32 = vor.u32 %v348_v14, %v347_v22  ;;  %v220_v36 = vmul.u32 %v218_v16, %v1090_v33 }
  0xb0   :  { %v223_v37 = vmul.u32 %v219_v17, %v217_v19  ;;  %v224_v38 = vshll.u32 %v221_v24, 16  ;;  %v366_v39 = vsel %vm356_vm7, %v352_v23, 1326507024  ;;  %v225_v41 = vshrl.u32 %v221_v24, 16 }
  0xb1   :  { %v242_v42 = vmul.u32 %v240_v20, %v1090_v33  ;;  %v244_v43 = vmul.u32 %v240_v20, %v217_v19  ;;  %v226_v31 = vshll.u32 %v222_v28, 16  ;;  %v246_v46 = vshll.u32 %v243_v29, 16 }
  0xb2   :  { %vm228_vm8 = vc.u32 %v220_v36, %v224_v38  ;;  %v230_v44 = vadd.s32 %v224_v38, %v220_v36  ;;  %v227_v47 = vshrl.u32 %v222_v28, 16  ;;  %v245_v50 = vmul.u32 %v241_v21, %v217_v19 }
  0xb3   :  { %v229_v48 = vsel %vm228_vm8, 1, %v952_v0  ;;  %v248_v51 = vshll.u32 %v244_v43, 16  ;;  %vm250_vm10 = vc.u32 %v242_v42, %v246_v46  ;;  %v252_v53 = vadd.s32 %v246_v46, %v242_v42 }
  0xb4   :  { %v231_v52 = vadd.s32 %v229_v48, %v223_v37  ;;  %vm232_vm9 = vc.u32 %v230_v44, %v226_v31  ;;  %v251_v55 = vsel %vm250_vm10, 1, %v952_v0  ;;  %v338_v33 = vshll.u32 %v955_v40, %v1103_v62 }
  0xb5   :  { %v233_v54 = vsel %vm232_vm9, 1, %v952_v0  ;;  %v339_v56 = vshrl.u32 %v957_v45, %v1113_v7  ;;  %v247_v58 = vshrl.u32 %v243_v29, 16  ;;  %v253_v59 = vadd.s32 %v251_v55, %v245_v50 }
  0xb6   :  { %v235_v57 = vadd.s32 %v233_v54, %v231_v52  ;;  %vm254_vm11 = vc.u32 %v252_v53, %v248_v51  ;;  %v341_v63 = vshll.u32 %v957_v45, %v1103_v62  ;;  %v342_v1 = vshrl.u32 %v958_v49, %v1113_v7 }
  0xb7   :  { %v255_v60 = vsel %vm254_vm11, 1, %v952_v0  ;;  %v1146_v61 = vor.u32 %v339_v56, %v338_v33  ;;  %v344_v4 = vshll.u32 %v958_v49, %v1103_v62  ;;  %v345_v5 = vshrl.u32 %v953_v35, %v1113_v7 }
  0xb8   :  { %v236_v2 = vadd.s32 %v235_v57, %v225_v41  ;;  %v257_v3 = vadd.s32 %v255_v60, %v253_v59  ;;  %v362_v8 = vsel %vm356_vm7, %v349_v32, 920167782  ;;  %v249_v9 = vshrl.u32 %v244_v43, 16 }
  0xb9   :  { %v1158_v10 = vor.u32 %v342_v1, %v341_v63  ;;  %vm353_vm12 = vcmp.lt.s32.totalorder %v1110_v6, 1  ;;  %v346_v13 = vor.u32 %v345_v5, %v344_v4  ;;  %vm355_vm13 = vcmp.lt.s32.totalorder %v1110_v6, 3 }
  0xba   :  { %v1161_v45 = vadd.s32 %v236_v2, %v227_v47  ;;  %v258_v11 = vadd.s32 %v257_v3, %v247_v58  ;;  %v1164_v14 = vadd.s32 %v252_v53, %v248_v51  ;;  %v367_v49 = vsel %vm355_vm13, %v349_v32, %v366_v39 }
  0xbb   :  { %v361_v35 = vsel %vm353_vm12, %v1146_v61, %v1158_v10  ;;  %v1172_v62 = vshll.u32 %v329_v30, 8  ;;  %v260_v16 = vmul.u32 %v1085_v27, %v1130_v26  ;;  %vm354_vm15 = vcmp.lt.s32.totalorder %v1110_v6, 2 }
  0xbc   :  { %v259_v15 = vadd.s32 %v258_v11, %v249_v9  ;;  %vm262_vm14 = vc.u32 %v1161_v45, %v1164_v14  ;;  %v363_v17 = vsel %vm355_vm13, %v346_v13, %v362_v8  ;;  %v365_v19 = vsel %vm353_vm12, %v1158_v10, %v346_v13 }
  0xbd   :  { %v364_v21 = vsel %vm354_vm15, %v361_v35, %v363_v17  ;;  %v368_v22 = vsel %vm354_vm15, %v365_v19, %v367_v49  ;;  %v370_v27 = vand.u32 65535, %v1172_v62  ;;  %v371_v23 = vshrl.u32 %v1172_v62, 16 }
  0xbe   :  { %v263_v20 = vadd.s32 1, %v259_v15  ;;  %v372_v24 = vand.u32 65535, %v368_v22  ;;  %v373_v26 = vshrl.u32 %v368_v22, 16  ;;  %v394_v28 = vand.u32 65535, %v364_v21 }
  0xbf   :  { %v395_v30 = vshrl.u32 %v364_v21, 16  ;;  %v358_v1 = vsel %vm356_vm7, %v346_v13, 2102212464  ;;  %v337_v4 = vshrl.u32 %v955_v40, %v1113_v7  ;;  %vm595_vm8 = vcmask 195584  }
  0xc0   :  { %v264_v29 = vsel %vm262_vm14, %v263_v20, %v259_v15  ;;  %v375_v36 = vmul.u32 %v373_v26, %v370_v27  ;;  %v376_v37 = vmul.u32 %v372_v24, %v371_v23  ;;  %v398_v39 = vmul.u32 %v394_v28, %v371_v23 }
  0xc1   :  { %v265_v32 = vadd.s32 %v264_v29, %v260_v16  ;;  %v397_v38 = vmul.u32 %v395_v30, %v370_v27  ;;  %v374_v42 = vmul.u32 %v372_v24, %v370_v27  ;;  %v377_v31 = vmul.u32 %v373_v26, %v371_v23 }
  0xc2   :  { %v378_v43 = vshll.u32 %v375_v36, 16  ;;  %v396_v44 = vmul.u32 %v394_v28, %v370_v27  ;;  %v380_v48 = vshll.u32 %v376_v37, 16  ;;  %v402_v52 = vshll.u32 %v398_v39, 16 }
  0xc3   :  { %v266_v41 = vadd.s32 536870912, %v265_v32  ;;  %v400_v46 = vshll.u32 %v397_v38, 16  ;;  %v399_v33 = vmul.u32 %v395_v30, %v371_v23  ;;  %v379_v59 = vshrl.u32 %v375_v36, 16 }
  0xc4   :  { %vm382_vm1 = vc.u32 %v374_v42, %v378_v43  ;;  %v384_v50 = vadd.s32 %v378_v43, %v374_v42  ;;  %v381_v8 = vshrl.u32 %v376_v37, 16  ;;  %v401_v9 = vshrl.u32 %v397_v38, 16  ;;  %v475_v37 = vld [vmem:[#allocation2] sm:$0xff]  ;;  %v594_v38 = vld [vmem:[%s1297_s9 + $0x10] sm:$0xff] }
  0xc5   :  { %v1190_v47 = vshrl.u32 %v266_v41, 30  ;;  %v383_v51 = vsel %vm382_vm1, 1, %v952_v0  ;;  %vm404_vm2 = vc.u32 %v396_v44, %v400_v46  ;;  %v406_v53 = vadd.s32 %v400_v46, %v396_v44  ;;  %683 = vmatmul.msk.f32.vlgmr.msra.gmra.mxu1 %vm513_vm0, %v475_v37  ;;  %615 = vmatpush.msra.mxu3 %v594_v38  ;;  %v590_v44 = vld [vmem:[#allocation7] sm:$0xff] }
  0xc6   :  { %v385_v55 = vadd.s32 %v383_v51, %v377_v31  ;;  %vm386_vm3 = vc.u32 %v384_v50, %v380_v48  ;;  %v405_v57 = vsel %vm404_vm2, 1, %v952_v0  ;;  %v357_v49 = vsel %vm353_vm12, %v337_v4, %v1146_v61 }
  0xc7   :  { %v268_v54 = vshll.u32 %v1190_v47, 30  ;;  %v387_v56 = vsel %vm386_vm3, 1, %v952_v0  ;;  %vm408_vm4 = vc.u32 %v406_v53, %v402_v52  ;;  %v407_v63 = vadd.s32 %v405_v57, %v399_v33 }
  0xc8   :  { %v389_v60 = vadd.s32 %v387_v56, %v385_v55  ;;  %v409_v2 = vsel %vm408_vm4, 1, %v952_v0  ;;  %v359_v13 = vsel %vm355_vm13, %v1158_v10, %v358_v1  ;;  %v403_v16 = vshrl.u32 %v398_v39, 16  ;;  %v544_v39 = vld [vmem:[#allocation5 + $0x8] sm:$0xff] }
  0xc9   :  { %v269_v58 = vsub.s32 %v265_v32, %v268_v54  ;;  %v411_v11 = vadd.s32 %v409_v2, %v407_v63  ;;  %v410_v19 = vadd.s32 %v406_v53, %v402_v52  ;;  %v360_v40 = vsel %vm354_vm15, %v357_v49, %v359_v13  ;;  %686 = vmatmul.msk.f32.gmra.mxu2 %vm513_vm0, %v544_v39 }
  0xca   :  { %v390_v5 = vadd.s32 %v389_v60, %v379_v59  ;;  %v414_v61 = vmul.u32 %v1172_v62, %v360_v40  ;;  %v261_v27 = vadd.s32 %v1164_v14, %v1161_v45  ;;  %v593_v45 = vld [vmem:[%s1297_s9 + $0x8] sm:$0xff]  ;;  %v592_v14 = vld [vmem:[%s1297_s9] sm:$0xff]  ;;  %vm169_vm10 = vcmp.lt.s32.totalorder %v1075_v12, 0 }
  0xcb   :  { %vm270_vm5 = vcmp.lt.s32.totalorder %v269_v58, 0  ;;  %v271_v3 = vsub.s32 0, %v269_v58  ;;  %v412_v17 = vadd.s32 %v411_v11, %v401_v9  ;;  %616 = vmatpush.msra.mxu3 %v593_v45  ;;  %vm1230_vm11 = vcmp.le.f32.partialorder %v167_v18, 0.7853982 }
  0xcc   :  { %v391_v0 = vadd.s32 %v390_v5, %v381_v8  ;;  %v291_v60 = vsub.s32 4, %v1190_v47  ;;  %vm323_vm15 = vcmp.lt.s32.totalorder %v1082_v25, 0  ;;  %vm483_vm2 = vcmask 130048  }
  0xcd   :  { %v272_v35 = vsel %vm270_vm5, %v271_v3, %v269_v58  ;;  %v413_v7 = vadd.s32 %v412_v17, %v403_v16  ;;  %617 = vmatpush.msra.mxu3 %v592_v14  ;;  %vm310_vm3 = vweird.f32 %v1075_v12  ;;  %vm1251_vm4 = vcmp.le.f32.partialorder %v321_v34, 0.7853982 }
  0xce   :  { %v273_v15 = vclz %v272_v35  ;;  %vm416_vm6 = vc.u32 %v391_v0, %v410_v19  ;;  %687 = vmatmul.msk.f32.vlgmr.msra.gmra.mxu3 %vm595_vm8, %v590_v44  ;;  %v415_v2 = vadd.s32 %v410_v19, %v391_v0  ;;  %v292_v11 = vsel %vm169_vm10, %v291_v60, %v1190_v47  ;;  %v476_v19 = vld [vmem:[#allocation2 + $0x8] sm:$0xff] }
  0xcf   :  { %v417_v21 = vadd.s32 1, %v413_v7  ;;  %684 = vmatmul.msk.f32.gmra.mxu1 %vm513_vm0, %v476_v19 }
  0xd0   :  { %v676_v20 = vadd.s32 4294967294, %v273_v15 }
  0xd1   :  { %v418_v24 = vsel %vm416_vm6, %v417_v21, %v413_v7  ;;  %v591_v7 = vld [vmem:[#allocation7 + $0x8] sm:$0xff] }
  0xd2   :  { %vm677_vm7 = vcmp.lt.s32.totalorder %v676_v20, 0  ;;  %v419_v26 = vadd.s32 %v418_v24, %v414_v61 }
  0xd3   :  { %v276_v22 = vsel %vm677_vm7, 0, %v676_v20  ;;  %v294_v20 = vsel %vm1230_vm11, 0, %v292_v11 }
  0xd4   :  { %v277_v10 = vsub.s32 32, %v276_v22  ;;  %v281_v23 = vsub.s32 4294967266, %v276_v22  ;;  %v278_v28 = vshll.u32 %v269_v58, %v276_v22  ;;  %v420_v32 = vadd.s32 536870912, %v419_v26 }
  0xd5   :  { %v311_v61 = vand.u32 3, %v294_v20 }
  0xd6   :  { %v279_v29 = vshrl.u32 %v261_v27, %v277_v10  ;;  %v282_v30 = vadd.s32 127, %v281_v23  ;;  %v1215_v62 = vshrl.u32 %v420_v32, 30  ;;  %688 = vmatmul.msk.f32.gmra.mxu3 %vm595_vm8, %v591_v7  ;;  %vm464_vm8 = vweird.f32 %v1082_v25 }
  0xd7   :  { %vm313_vm13 = vcmp.eq.s32.totalorder %v311_v61, 0  ;;  %vm316_vm14 = vcmp.eq.s32.totalorder %v311_v61, 2  ;;  %vm312_vm1 = vcmp.lt.s32.totalorder %v311_v61, 2 }
  0xd8   :  { %v280_v6 = vor.u32 %v279_v29, %v278_v28  ;;  %v283_v36 = vshll.u32 %v282_v30, 23  ;;  %v422_v42 = vshll.u32 %v1215_v62, 30  ;;  %v445_v14 = vsub.s32 4, %v1215_v62 }
  0xda   :  { %v284_v41 = vor.u32 4788187, %v283_v36  ;;  %v287_v31 = vcvt.s32.f32 %v280_v6  ;;  %v423_v46 = vsub.s32 %v419_v26, %v422_v42  ;;  %v446_v44 = vsel %vm323_vm15, %v445_v14, %v1215_v62 }
  0xdc   :  { %v285_v43 = vand.u32 2147483647, %v284_v41  ;;  %vm424_vm9 = vcmp.lt.s32.totalorder %v423_v46, 0  ;;  %v425_v50 = vsub.s32 0, %v423_v46 }
  0xde   :  { %v288_v48 = vmul.f32 %v287_v31, %v285_v43  ;;  %v426_v52 = vsel %vm424_vm9, %v425_v50, %v423_v46  ;;  %v448_v50 = vsel %vm1251_vm4, 0, %v446_v44 }
  0xdf   :  { %v427_v55 = vclz %v426_v52 }
  0xe0   :  { %v289_v51 = vxor.u32 2147483648, %v288_v48 }
  0xe1   :  { %v679_v57 = vadd.s32 4294967294, %v427_v55  ;;  %v465_v55 = vand.u32 3, %v448_v50 }
  0xe2   :  { %v290_v54 = vsel %vm169_vm10, %v289_v51, %v288_v48 }
  0xe3   :  { %v293_v33 = vsel %vm1230_vm11, %v1075_v12, %v290_v54  ;;  %vm680_vm12 = vcmp.lt.s32.totalorder %v679_v57, 0  ;;  %vm467_vm5 = vcmp.eq.s32.totalorder %v465_v55, 0  ;;  %vm470_vm6 = vcmp.eq.s32.totalorder %v465_v55, 2 }
  0xe4   :  { %v295_v56 = vmul.f32 %v293_v33, %v293_v33  ;;  %v430_v63 = vsel %vm680_vm12, 0, %v679_v57  ;;  %vm466_vm7 = vcmp.lt.s32.totalorder %v465_v55, 2 }
  0xe5   :  { %v431_v3 = vsub.s32 32, %v430_v63  ;;  %v435_v4 = vsub.s32 4294967266, %v430_v63  ;;  %v432_v35 = vshll.u32 %v423_v46, %v430_v63 }
  0xe6   :  { %v296_v58 = vmul.f32 -0.001358992, %v295_v56  ;;  %v303_v59 = vmul.f32 -0.00019511016, %v295_v56 }
  0xe7   :  { %v433_v9 = vshrl.u32 %v415_v2, %v431_v3  ;;  %v436_v49 = vadd.s32 127, %v435_v4  ;;  %v709_v3 = vld [vmem:[#allocation13] ss:$0 sm:$0xff] }
  0xe8   :  { %v297_v18 = vadd.f32 0.041655596, %v296_v58  ;;  %v304_v1 = vadd.f32 0.008332121, %v303_v59 }
  0xe9   :  { %v434_v16 = vor.u32 %v433_v9, %v432_v35  ;;  %v437_v17 = vshll.u32 %v436_v49, 23  ;;  %v710_v9 = vld [vmem:[%s1298_s10] ss:$0 sm:$0xff]  ;;  %s641_s10 = sshll.u32 %s1299_s11, 4  ;;  %s642_s10 = int_to_ptr.hbm [resolvable:$true] %s641_s10 }
  0xea   :  { %v298_v5 = vmul.f32 %v297_v18, %v295_v56  ;;  %v305_v8 = vmul.f32 %v304_v1, %v295_v56  ;;  %v572_v1 = vpop.f32.mrf.mxu2 }
  0xeb   :  { %v438_v21 = vor.u32 4788187, %v437_v17  ;;  %v441_v10 = vcvt.s32.f32 %v434_v16 }
  0xec   :  { %v299_v13 = vadd.f32 -0.4999988, %v298_v5  ;;  %v306_v15 = vadd.f32 -0.16666654, %v305_v8 }
  0xed   :  { %v439_v27 = vand.u32 2147483647, %v438_v21 }
  0xee   :  { %v300_v40 = vmul.f32 %v299_v13, %v295_v56  ;;  %v307_v0 = vmul.f32 %v306_v15, %v295_v56 }
  0xef   :  { %v442_v26 = vmul.f32 %v441_v10, %v439_v27 }
  0xf0   :  { %v301_v22 = vadd.f32 1.0, %v300_v40  ;;  %v308_v47 = vadd.f32 1.0, %v307_v0 }
  0xf1   :  { %v443_v29 = vxor.u32 2147483648, %v442_v26 }
  0xf2   :  { %v309_v23 = vmul.f32 %v308_v47, %v293_v33  ;;  %v317_v24 = vxor.u32 2147483648, %v301_v22 }
  0xf3   :  { %v444_v37 = vsel %vm323_vm15, %v443_v29, %v442_v26 }
  0xf4   :  { %v314_v28 = vxor.u32 2147483648, %v309_v23  ;;  %v318_v32 = vsel %vm316_vm14, %v317_v24, %v309_v23  ;;  %v447_v39 = vsel %vm1251_vm4, %v1082_v25, %v444_v37 }
  0xf5   :  { %v449_v41 = vmul.f32 %v447_v39, %v447_v39 }
  0xf6   :  { %v315_v30 = vsel %vm313_vm13, %v301_v22, %v314_v28 }
  0xf7   :  { %v319_v6 = vsel %vm312_vm1, %v315_v30, %v318_v32  ;;  %v450_v45 = vmul.f32 -0.001358992, %v449_v41  ;;  %v457_v12 = vmul.f32 -0.00019511016, %v449_v41 }
  0xf8   :  { %v320_v38 = vsel %vm310_vm3, nan, %v319_v6 }
  0xf9   :  { %681 = vmatmul.msk.f32.vlgmr.msra.gmra.mxu0 %vm483_vm2, %v320_v38  ;;  %v451_v42 = vadd.f32 0.041655596, %v450_v45  ;;  %v458_v34 = vadd.f32 0.008332121, %v457_v12 }
  0xfb   :  { %v452_v43 = vmul.f32 %v451_v42, %v449_v41  ;;  %v459_v31 = vmul.f32 %v458_v34, %v449_v41 }
  0xfd   :  { %v453_v46 = vadd.f32 -0.4999988, %v452_v43  ;;  %v460_v48 = vadd.f32 -0.16666654, %v459_v31 }
  0xff   :  { %v454_v51 = vmul.f32 %v453_v46, %v449_v41  ;;  %v461_v52 = vmul.f32 %v460_v48, %v449_v41 }
 0x101   :  { %v455_v53 = vadd.f32 1.0, %v454_v51  ;;  %v462_v54 = vadd.f32 1.0, %v461_v52 }
 0x103   :  { %v463_v33 = vmul.f32 %v462_v54, %v447_v39  ;;  %v471_v56 = vxor.u32 2147483648, %v455_v53 }
 0x105   :  { %v468_v57 = vxor.u32 2147483648, %v463_v33  ;;  %v472_v59 = vsel %vm470_vm6, %v471_v56, %v463_v33 }
 0x107   :  { %v469_v58 = vsel %vm467_vm5, %v455_v53, %v468_v57 }
 0x108   :  { %v473_v62 = vsel %vm466_vm7, %v469_v58, %v472_v59 }
 0x109   :  { %v474_v60 = vsel %vm464_vm8, nan, %v473_v62 }
 0x10a   :  { %682 = vmatmul.msk.f32.gmra.mxu0 %vm483_vm2, %v474_v60 }
 0x142   :  { %v537_v63 = vpop.f32.mrf.mxu1 }
 0x14c   :  { %v540_v49 = vpop.f32.mrf.mxu1  ;;  %v575_v15 = vpop.f32.mrf.mxu2 }
 0x151   :  { %v619_v8 = vpop.f32.mrf.mxu3 }
 0x159   :  { %v622_v40 = vpop.f32.mrf.mxu3 }
 0x176   :  { %v507_v18 = vpop.f32.mrf.mxu0 }
 0x177   :  { %v538_v2 = vadd.f32 %v537_v63, %v507_v18 }
 0x179   :  { %v578_v4 = vadd.f32 %v572_v1, %v538_v2 }
 0x17b   :  { %v584_v5 = vadd.f32 %v709_v3, %v578_v4 }
 0x17d   :  { %711 = vtanh.f32 %v584_v5 }
 0x183   :  { %v712_v11 = vpop.eup %711 }
 0x184   :  { %588 = vst.msk [vmem:[#allocation14] sm:$0xff] %vm513_vm0, %v712_v11  ;;  %v625_v25 = vadd.f32 %v712_v11, %v619_v8 }
 0x186   :  { %v631_v35 = vadd.f32 %v710_v9, %v625_v25 }
 0x187   :  { %v510_v13 = vpop.f32.mrf.mxu0 }
 0x188   :  { %633 = vst.msk [vmem:[#allocation15] sm:$0xff] %vm513_vm0, %v631_v35  ;;  %v541_v16 = vadd.f32 %v540_v49, %v510_v13 }
 0x18a   :  { %v579_v17 = vadd.f32 %v575_v15, %v541_v16 }
 0x18c   :  { %v585_v20 = vadd.f32 %v709_v3, %v579_v17 }
 0x18e   :  { %713 = vtanh.f32 %v585_v20 }
 0x194   :  { %v714_v0 = vpop.eup %713 }
 0x195   :  { %589 = vst.msk [vmem:[#allocation14 + $0x8] sm:$0xff] %vm513_vm0, %v714_v0  ;;  %v626_v19 = vadd.f32 %v714_v0, %v622_v40 }
 0x196   :  { %647 = dma.vmem_to_hbm [thread:$0]  %s640_s25, 256, %s642_s10, [#allocation4], %s944_s29, %s944_s29, %s945_s30  }
 0x197   :  { %v632_v7 = vadd.f32 %v710_v9, %v626_v19 }
 0x199   :  { %634 = vst.msk [vmem:[#allocation15 + $0x8] sm:$0xff] %vm513_vm0, %v632_v7 }
 0x19a   :  { %660 = dma.vmem_to_hbm [thread:$0]  %s653_s13, 256, %s655_s15, [#allocation16], %s944_s29, %s944_s29, %s945_s30  }
 0x19b   :  { %939 = dma.done.wait [#allocation4], 256  }
 0x19c   :  { %940 = vsyncadd [#allocation4], 4294967040 }
 0x19d   :  { %941 = dma.done.wait [#allocation16], 256  }
 0x19e   :  { %942 = vsyncadd [#allocation16], 4294967040 }
 0x19f   :  { %669 = vsyncpa [#allocation3], 1 }
 0x1a0   :  { %670 = vsyncpa [#allocation6], 1 }
 0x1a1   :  { %671 = vsyncpa [#allocation9], 1 }
 0x1a2   :  { %672 = vsyncpa [#allocation12], 1 }
 0x1a3   :  { %673 = vsyncpa [#allocation4], 1 }
 0x1a4   :  { %674 = vsyncpa [#allocation16], 1 }

</bundles_post_ra>
